<compile_context>
chip_gen: v7x
topology: tpu7x:2x2x1
jax: 0.10.0
libtpu: 0.0.40
codegen_flags: <defaults>
</compile_context>

<pallas_src>
import jax
import jax.numpy as jnp
from jax import lax
from jax.experimental import pallas as pl
from jax.experimental.pallas import tpu as pltpu


def _score_kernel(q_ref, d_ref, o_ref):
    # q_ref: (1, D) bf16 tile (reused every step)
    # d_ref: (D, TN) bf16 tile of pre-transposed docs
    # o_ref: (1, TN) f32 scores tile (lane-dense output)
    o_ref[...] = jnp.dot(
        q_ref[...], d_ref[...], preferred_element_type=jnp.float32
    ).astype(o_ref.dtype)


def dense_scores(
    query_vector: jax.Array,
    doc_reps: jax.Array,
    *,
    tn: int = 512,
    stream_dtype=jnp.bfloat16,
):
    """scores = query_vector @ doc_reps.T, computed tile-by-tile on TPU.

    query_vector: (1, D) float32
    doc_reps:     (N, D) float32 (any N; padded internally to a tile multiple)
    returns:      (N,)   float32
    """
    N, D = doc_reps.shape
    assert query_vector.shape == (1, D)

    # Pad the doc axis to a multiple of tn (pad rows are zeros; their scores
    # are sliced off before returning, so they can never reach top-k).
    n_pad = (-N) % tn
    if n_pad:
        doc_reps = jnp.pad(doc_reps, ((0, n_pad), (0, 0)))
    Np = N + n_pad

    # One-time layout / dtype prep in the wrapper (docs are a static index in
    # the real module, so this cost is amortized across queries):
    #   - cast to bf16 to halve HBM traffic on this bandwidth-bound GEMV
    #   - transpose to (D, Np) so the kernel matmul is canonical (M,K)x(K,N)
    docs_t = doc_reps.astype(stream_dtype).T          # (D, Np)
    q = query_vector.astype(stream_dtype)             # (1, D)

    grid = (Np // tn,)
    out = pl.pallas_call(
        _score_kernel,
        out_shape=jax.ShapeDtypeStruct((1, Np), jnp.float32),
        grid_spec=pltpu.PrefetchScalarGridSpec(
            num_scalar_prefetch=0,
            grid=grid,
            in_specs=[
                # query: same (1, D) block every grid step
                pl.BlockSpec((1, D), lambda i: (0, 0)),
                # docs (pre-transposed): i-th (D, tn) column tile
                # TODO(synk): if profiling shows exposed doc-tile DMA at large
                # tn, add pipeline_mode=pl.Buffered(3) here.
                pl.BlockSpec((D, tn), lambda i: (0, i)),
            ],
            out_specs=pl.BlockSpec((1, tn), lambda i: (0, i)),
        ),
        compiler_params=pltpu.CompilerParams(
            dimension_semantics=("parallel",)
        ),
    )(q, docs_t)
    return out[0, :N]  # matches torch.mm(q, D.T)[0]


def retrieve(query_vector: jax.Array, doc_reps: jax.Array, k: int = 5):
    """Pallas-backed equivalent of DenseRetriever.retrieve (index selection)."""
    scores = dense_scores(query_vector, doc_reps)
    # TODO(synk): top-k selection itself has no dedicated Pallas kernel here;
    # jax.lax.top_k (O(N) on TPU) replaces torch.argsort(descending=True)[:k].
    _, idx = lax.top_k(scores, k)
    return scores, idx


if __name__ == "__main__":
    key = jax.random.PRNGKey(0)
    k_docs, k_query = jax.random.split(key)

    # Small, deterministic stand-ins for SentenceTransformer embeddings.
    # N deliberately NOT a multiple of the tile size to exercise the pad path.
    N, D = 1000, 128
    doc_reps = jax.random.normal(k_docs, (N, D), dtype=jnp.float32)
    query_vector = jax.random.normal(k_query, (1, D), dtype=jnp.float32)

    k_top = 5
    scores, topk_idx = retrieve(query_vector, doc_reps, k=k_top)
    jax.block_until_ready((scores, topk_idx))
    assert scores.shape == (N,)
    assert topk_idx.shape == (k_top,)

    # Reference 1: same-precision JAX computation (bf16 stream, f32 accum) --
    # tight check of the kernel itself.
    ref_bf16 = jnp.dot(
        query_vector.astype(jnp.bfloat16),
        doc_reps.astype(jnp.bfloat16).T,
        preferred_element_type=jnp.float32,
    )[0]
    assert jnp.allclose(scores, ref_bf16, atol=1e-2, rtol=1e-2), "kernel/bf16-ref mismatch"

    # Reference 2: full-f32 torch.mm semantics -- loose check (bf16 storage
    # shifts scores slightly), plus retrieval-quality check on top-k values.
    ref_f32 = (query_vector @ doc_reps.T)[0]
    assert jnp.allclose(scores, ref_f32, atol=0.5, rtol=5e-2), "score drift too large"
    ref_topk_vals, _ = lax.top_k(ref_f32, k_top)
    got_topk_vals = ref_f32[topk_idx]
    assert jnp.allclose(got_topk_vals, ref_topk_vals, atol=0.5, rtol=5e-2), "top-k mismatch"

    print("KERNEL_OK")
</pallas_src>

<mosaic_0001>
module attributes {stable_mosaic.version = 11 : i64} {
  func.func @_score_kernel(%arg0: i32, %arg1: memref<1x128xbf16, #tpu.memory_space<vmem>>, %arg2: memref<128x512xbf16, #tpu.memory_space<vmem>>, %arg3: memref<1x512xf32, #tpu.memory_space<vmem>>) attributes {dimension_semantics = [#tpu.dimension_semantics<parallel>], iteration_bounds = array<i64: 2>, scalar_prefetch = 0 : i64, scratch_operands = 0 : i64, tpu.core_type = #tpu.core_type<tc>, window_params = [{pipeline_mode = #tpu.pipeline_mode<synchronous>, transform_indices = @transform_0, window_bounds = array<i64: 1, 128>}, {transform_indices = @transform_1, window_bounds = array<i64: 128, 512>}, {transform_indices = @transform_2, window_bounds = array<i64: 1, 512>}]} {
    %c0 = arith.constant 0 : index
    %c0_0 = arith.constant 0 : index
    %0 = vector.load %arg1[%c0, %c0_0] : memref<1x128xbf16, #tpu.memory_space<vmem>>, vector<1x128xbf16>
    %c0_1 = arith.constant 0 : index
    %c0_2 = arith.constant 0 : index
    %1 = vector.load %arg2[%c0_1, %c0_2] : memref<128x512xbf16, #tpu.memory_space<vmem>>, vector<128x512xbf16>
    %cst = arith.constant dense<0.000000e+00> : vector<1x512xf32>
    %2 = tpu.matmul %0, %1, %cst {dimension_numbers = #tpu.dot_dimension_numbers<[1], [0], [0], [1], [0, 0, 1, 1], [], []>} : vector<1x128xbf16>, vector<128x512xbf16>, vector<1x512xf32> -> vector<1x512xf32>
    %c0_3 = arith.constant 0 : index
    %c0_4 = arith.constant 0 : index
    %3 = vector.load %arg3[%c0_3, %c0_4] : memref<1x512xf32, #tpu.memory_space<vmem>>, vector<1x512xf32>
    tpu.vector_store %arg3[%c0_3, %c0_4], %2 {strides = array<i32>} : memref<1x512xf32, #tpu.memory_space<vmem>>, vector<1x512xf32>,
    return
  }
  func.func @transform_0(%arg0: i32) -> (i32, i32) {
    %c0_i32 = arith.constant 0 : i32
    %c0_i32_0 = arith.constant 0 : i32
    %c0_i32_1 = arith.constant 0 : i32
    return %c0_i32, %c0_i32_0 : i32, i32
  }
  func.func @transform_1(%arg0: i32) -> (i32, i32) {
    %c0_i32 = arith.constant 0 : i32
    %c0_i32_0 = arith.constant 0 : i32
    return %c0_i32, %arg0 : i32, i32
  }
  func.func @transform_2(%arg0: i32) -> (i32, i32) {
    %c0_i32 = arith.constant 0 : i32
    %c0_i32_0 = arith.constant 0 : i32
    return %c0_i32, %arg0 : i32, i32
  }
}

</mosaic_0001>

<bundles_post_ra>
// kernel: tpu_custom_call.1
= control target key start
LH: loop header
LB: loop body
LE: loop exit
PB: predicated region body
PF: predicated region fallthrough
CT: control target
= control target key end

     0   :  { %7 = vsyncpa [#allocation3], 0  ;;  %s1128_s0 = inlined_call_operand.hbm [shape: bf16[1,128], index: 0, kind: input, shape index: {}]   ;;  %s1129_s1 = inlined_call_operand.hbm [shape: bf16[128,1024], index: 1, kind: input, shape index: {}]   ;;  %s1130_s2 = inlined_call_operand.hbm [shape: f32[1,1024], index: 2, kind: output, shape index: {}]  }
   0x1   :  { %8 = vsyncpa [#allocation6], 0 }
   0x2   :  { %10 = vsyncpa [#allocation6 + $0x1], 0 }
   0x3   :  { %11 = vsyncpa [#allocation4], 0 }
   0x4   :  { %13 = vsyncpa [#allocation4 + $0x1], 0  ;;  %s897_s9 = smov 0   ;;  %s899_s10 = smov 0  }
   0x5   :  { %s901_s11 = smov 0   ;;  %s903_s12 = smov 0  }
   0x6 LB: > { %s918_s13 = sadd.s32 4294967295, %s872_s12   ;;  %s584_s14 = sadd.s32 4294967294, %s872_s12   ;;  %s872_s12 = sphi %s903_s12, %s1155_s12   ;;  %s868_s11 = sphi %s901_s11, %s1154_s11   ;;  %s864_s10 = sphi %s899_s10, %s1153_s10   ;;  %s860_s9 = sphi %s897_s9, %s1152_s9  }
   0x7   : > { %s922_s15 = sadd.s32 1, %s872_s12   ;;  %s47_s16 = sadd.s32 1, %s868_s11 }
   0x8   : > { %s44_s17 = ssub.s32 %s872_s12, %s922_s15  ;;  %p54_p0 = scmp.ne.s32.totalorder %s868_s11, %s864_s10 }
   0x9   : > { %p45_p1 = scmp.eq.s32.totalorder %s44_s17, 0  ;;  %p55_p2 = scmp.eq.s32.totalorder %s872_s12, 0 }
   0xa   : > { %p60_p3 = scmp.ne.s32.totalorder %s864_s10, %s860_s9  ;;  %p1131_p4 = scmp.eq.s32.totalorder %s918_s13, 0 }
   0xb   : > { %s934_s18 = scalar_select %p45_p1, %s868_s11, %s47_s16  }
   0xc   : > { %p936_p5 = por %p55_p2, %p54_p0  ;;  %p942_p6 = por %p1131_p4, %p60_p3 }
   0xd   : > { %p84_p7 = scmp.eq.s32.totalorder %s918_s13, 1  ;;  %p90_p8 = scmp.eq.s32.totalorder %s584_s14, 1 }
   0xe   : > { %s1137_s20 = scalar_select %p942_p6, 1, 0 }
   0xf   : > { %p585_p9 = scmp.ge.s32.totalorder %s872_s12, 1  ;;  %p97_p10 = scmp.lt.s32.totalorder %s872_s12, 3 }
  0x10   : > { %p949_p11 = por %p84_p7, %p54_p0  ;;  %p953_p12 = por %p90_p8, %p60_p3 }
  0x11   : > { %p957_p13 = pnand %p585_p9, %p97_p10  ;;  %s874_s24 = smov [#allocation2]  }
  0x12   : > { %s1138_s21 = scalar_select %p949_p11, 1, 0 }
  0x13   : > { %s1139_s22 = scalar_select %p953_p12, 1, 0 }
  0x14   : > { %s1140_s23 = scalar_select %p957_p13, 1, 0 }
  0x15   : > { %p642_p2 = pneg %p957_p13  ;;  %s110_s25 = sshll.u32 %s874_s24, 4  ;;  %s111_s25 = int_to_ptr.vmem [resolvable:$true] %s110_s25 }
  0x16   : > { %p655_p4 = scmp.lt.s32.totalorder %s872_s12, 2  ;;  %p1141_p0 = scmp.eq.s32.totalorder %s918_s13, 0 }
  0x17   : > { %s121_s27 = sand.u32 1, %s868_s11   ;;  %s744_s4 = scalar_lea.hbm %s1128_s0, 16 }
  0x18   : > { %p967_p7 = pnand %p642_p2, %p1141_p0  ;;  %p974_p3 = pnand %p655_p4, %p936_p5 }
  0x19   : > { %s588_s29 = sshll.u32 %s121_s27, 8  ;;  %p745_p8 = scmp.ne.s32.totalorder %s1128_s0, %s744_s4 }
  0x1a   : > { %s1143_s28 = scalar_select %p974_p3, 1, 0 }
  0x1b   : > { %p746_p9 = pneg %p967_p7  ;;  %p751_p4 = scmp.lt.u32.totalorder %s744_s4, %s1128_s0 }
  0x1d   : > { %p747_p10 = pnand %p746_p9, %p745_p8 }
  0x1f   : > { %p748_p2 = pneg %p747_p10 }
  0x21   : > { %p753_p5 = pnand %p751_p4, %p748_p2 }
  0x23   : > { %756 = shalt.err (!%p753_p5)
}
  0x24   : > { %s757_s14 = scalar_lea.vmem %s111_s25, 16  ;;  %s764_s16 = scalar_lea.vmem %s111_s25, 32 }
  0x25   : > { %p758_p0 = scmp.ne.s32.totalorder %s111_s25, %s757_s14  ;;  %p765_p11 = scmp.lt.s32.totalorder %s111_s25, %s111_s25 }
  0x26   : > { %p766_p6 = scmp.lt.s32.totalorder %s764_s16, %s757_s14 }
  0x27   : > { %p760_p1 = pnand %p758_p0, %p746_p9 }
  0x28   : > { %p767_p13 = por %p766_p6, %p765_p11 }
  0x29   : > { %p761_p12 = pneg %p760_p1 }
  0x2b   : > { %p768_p3 = pnand %p767_p13, %p761_p12 }
  0x2d   : > { %771 = shalt.err (!%p768_p3)
}
  0x2e   : > { %645 = dma.hbm_to_vmem [thread:$0]  (!%p967_p7), %s1128_s0, 16, %s111_s25, [#allocation3]  }
  0x2f   : > { %s632_s24 = sshll.u32 %s872_s12, 8  ;;  %s125_s30 = scalar_lea.vmem [#allocation5], %s588_s29 }
  0x30   : > { %s132_s3 = sshll.u32 %s125_s30, 4  ;;  %s998_s6 = scalar_lea.hbm %s1129_s1, %s632_s24  ;;  %s1000_s3 = int_to_ptr.vmem [resolvable:$true] %s132_s3 }
  0x31   : > { %s1002_s26 = scalar_lea.sflag [#allocation6], %s121_s27  ;;  %s772_s7 = scalar_lea.hbm %s998_s6, 4096 }
  0x32   : > { %p773_p6 = scmp.ne.s32.totalorder %s998_s6, %s772_s7  ;;  %p1144_p11 = scmp.ne.s32.totalorder %s1143_s28, 0 }
  0x33   : > { %s777_s8 = scalar_lea.hbm %s1129_s1, 8192  ;;  %p778_p7 = scmp.lt.u32.totalorder %s998_s6, %s1129_s1 }
  0x34   : > { %p774_p12 = pneg %p1144_p11  ;;  %p779_p3 = scmp.lt.u32.totalorder %s777_s8, %s772_s7 }
  0x35   : > { %p781_p9 = scmp.lt.u32.totalorder %s772_s7, %s998_s6 }
  0x36   : > { %p775_p13 = pnand %p774_p12, %p773_p6  ;;  %p780_p8 = por %p779_p3, %p778_p7 }
  0x38   : > { %p776_p1 = pneg %p775_p13  ;;  %p782_p10 = por %p781_p9, %p780_p8 }
  0x3a   : > { %p783_p2 = pnand %p782_p10, %p776_p1 }
  0x3c   : > { %786 = shalt.err (!%p783_p2)
}
  0x3d   : > { %s787_s27 = scalar_lea.vmem %s1000_s3, 4096  ;;  %s875_s17 = smov [#allocation5]  }
  0x3e   : > { %p788_p4 = scmp.ne.s32.totalorder %s1000_s3, %s787_s27  ;;  %s792_s19 = sshll.u32 %s875_s17, 4  ;;  %s793_s19 = int_to_ptr.vmem [resolvable:$false] %s792_s19 }
  0x3f   : > { %s794_s24 = scalar_lea.vmem %s793_s19, 8192  ;;  %p795_p6 = scmp.lt.s32.totalorder %s1000_s3, %s793_s19 }
  0x40   : > { %p790_p5 = pnand %p788_p4, %p774_p12  ;;  %p796_p13 = scmp.lt.s32.totalorder %s794_s24, %s787_s27 }
  0x42   : > { %p791_p0 = pneg %p790_p5  ;;  %p797_p7 = por %p796_p13, %p795_p6 }
  0x44   : > { %p798_p3 = pnand %p797_p7, %p791_p0 }
  0x46   : > { %801 = shalt.err (!%p798_p3)
}
  0x47   : > { %s876_s30 = smov 512   ;;  %s877_s4 = smov 256  }
  0x48   : > { %s878_s5 = smov 16   ;;  %p1145_p12 = scmp.ne.s32.totalorder %s1140_s23, 0 }
  0x49   : > { %649 = dma.hbm_to_vmem [thread:$0]  (!%p1144_p11), %s998_s6, 4096, %s1000_s3, %s1002_s26, %s876_s30, %s877_s4, %s878_s5  }
  0x4a   : > { %144 = sbr.rel (%p1145_p12) target bundleno = 355 (0x163), region = 28  ;;  %p1146_p1 = scmp.eq.s32.totalorder (!%p1145_p12), %s918_s13, 0 }
  0x51   : > { %847 = dma.done.wait (%p1146_p1), [#allocation3], 16   ;;  %p1147_p8 = pmov %p1146_p1 }
  0x52   : > { %s1037_s7 = sand.u32 1, %s864_s10   ;;  %p1148_p11 = scmp.ne.s32.totalorder %s1137_s20, 0 }
  0x53   : > { %849 = vsyncadd (%p1147_p8), [#allocation3], 4294967280  ;;  %s593_s25 = sshll.u32 %s1037_s7, 8  ;;  %s151_s29 = scalar_lea.sflag [#allocation6], %s1037_s7 }
  0x54   : > { %s1041_s8 = scalar_lea.vmem [#allocation5], %s593_s25 }
  0x55   : > { %851 = dma.done.wait (%p1148_p11), %s151_s29, 4096  }
  0x56   : > { %853 = vsyncadd (%p1148_p11), %s151_s29, 4294963200  ;;  %v879_v0 = vmov 0   ;;  %v696_v1 = vld [vmem:[%s1041_s8 + $0x4] ss:$16 sps:$4 sm:$0xff]   ;;  %v698_v2 = vld [vmem:[%s1041_s8 + $0xc] ss:$16 sps:$4 sm:$0xff]   ;;  %v462_v36 = vlaneseq }
  0x57   : > { %403 = vmatprep.mubr.bf16.mxu0 %v879_v0  ;;  %444 = vmatprep.mubr.bf16.mxu1 %v879_v0  ;;  %v700_v3 = vld [vmem:[%s1041_s8] ss:$16 sps:$4 sm:$0xff]   ;;  %v701_v4 = vld [vmem:[%s1041_s8 + $0x8] ss:$16 sps:$4 sm:$0xff]   ;;  %v702_v5 = vld [vmem:[%s1041_s8 + $0x24] ss:$16 sps:$4 sm:$0xff]  }
  0x58   : > { %371 = vmatprep.subr.bf16.mxu0 %v696_v1  ;;  %412 = vmatprep.subr.bf16.mxu1 %v698_v2  ;;  %v704_v6 = vld [vmem:[%s1041_s8 + $0x2c] ss:$16 sps:$4 sm:$0xff]   ;;  %v706_v7 = vld [vmem:[%s1041_s8 + $0x20] ss:$16 sps:$4 sm:$0xff]   ;;  %v707_v8 = vld [vmem:[%s1041_s8 + $0x28] ss:$16 sps:$4 sm:$0xff]  }
  0x59   : > { %372 = vmatpush1.bf16.msra.mxu0 %v700_v3  ;;  %413 = vmatpush1.bf16.msra.mxu1 %v701_v4  ;;  %v708_v9 = vld [vmem:[%s1041_s8 + $0x44] ss:$16 sps:$4 sm:$0xff]   ;;  %v710_v10 = vld [vmem:[%s1041_s8 + $0x4c] ss:$16 sps:$4 sm:$0xff]   ;;  %v712_v11 = vld [vmem:[%s1041_s8 + $0x40] ss:$16 sps:$4 sm:$0xff]  }
  0x5a   : > { %373 = vmatprep.subr.bf16.mxu0 %v702_v5  ;;  %414 = vmatprep.subr.bf16.mxu1 %v704_v6  ;;  %v713_v12 = vld [vmem:[%s1041_s8 + $0x48] ss:$16 sps:$4 sm:$0xff]   ;;  %v714_v13 = vld [vmem:[%s1041_s8 + $0x64] ss:$16 sps:$4 sm:$0xff]   ;;  %v716_v14 = vld [vmem:[%s1041_s8 + $0x6c] ss:$16 sps:$4 sm:$0xff]  }
  0x5b   : > { %v718_v15 = vld [vmem:[%s1041_s8 + $0x60] ss:$16 sps:$4 sm:$0xff]   ;;  %v719_v16 = vld [vmem:[%s1041_s8 + $0x68] ss:$16 sps:$4 sm:$0xff]   ;;  %v720_v17 = vld [vmem:[%s1041_s8 + $0x84] ss:$16 sps:$4 sm:$0xff]  }
  0x5c   : > { %v722_v18 = vld [vmem:[%s1041_s8 + $0x8c] ss:$16 sps:$4 sm:$0xff]   ;;  %v724_v19 = vld [vmem:[%s1041_s8 + $0x80] ss:$16 sps:$4 sm:$0xff]   ;;  %v725_v20 = vld [vmem:[%s1041_s8 + $0x88] ss:$16 sps:$4 sm:$0xff]  }
  0x5d   : > { %374 = vmatpush1.bf16.msra.mxu0 %v706_v7  ;;  %415 = vmatpush1.bf16.msra.mxu1 %v707_v8  ;;  %v726_v21 = vld [vmem:[%s1041_s8 + $0xa4] ss:$16 sps:$4 sm:$0xff]   ;;  %v728_v22 = vld [vmem:[%s1041_s8 + $0xac] ss:$16 sps:$4 sm:$0xff]   ;;  %v730_v23 = vld [vmem:[%s1041_s8 + $0xa0] ss:$16 sps:$4 sm:$0xff]  }
  0x5e   : > { %375 = vmatprep.subr.bf16.mxu0 %v708_v9  ;;  %416 = vmatprep.subr.bf16.mxu1 %v710_v10  ;;  %v731_v24 = vld [vmem:[%s1041_s8 + $0xa8] ss:$16 sps:$4 sm:$0xff]   ;;  %v732_v25 = vld [vmem:[%s1041_s8 + $0xc4] ss:$16 sps:$4 sm:$0xff]   ;;  %v734_v26 = vld [vmem:[%s1041_s8 + $0xcc] ss:$16 sps:$4 sm:$0xff]  }
  0x5f   : > { %v736_v27 = vld [vmem:[%s1041_s8 + $0xc0] ss:$16 sps:$4 sm:$0xff]   ;;  %v737_v28 = vld [vmem:[%s1041_s8 + $0xc8] ss:$16 sps:$4 sm:$0xff]   ;;  %v738_v29 = vld [vmem:[%s1041_s8 + $0xe4] ss:$16 sps:$4 sm:$0xff]  }
  0x60   : > { %v740_v30 = vld [vmem:[%s1041_s8 + $0xec] ss:$16 sps:$4 sm:$0xff]   ;;  %v742_v31 = vld [vmem:[%s1041_s8 + $0xe0] ss:$16 sps:$4 sm:$0xff]   ;;  %v743_v32 = vld [vmem:[%s1041_s8 + $0xe8] ss:$16 sps:$4 sm:$0xff]  }
  0x61   : > { %376 = vmatpush1.bf16.msra.mxu0 %v712_v11  ;;  %417 = vmatpush1.bf16.msra.mxu1 %v713_v12  ;;  %v178_v33 = vld [vmem:[#allocation2] sm:$0x1]  ;;  %v880_v34 = vmov 1966171168   ;;  %v463_v38 = vshrl.u32 %v462_v36, 7  ;;  %s594_s20 = sshll.u32 %s1037_s7, 2 }
  0x62   : > { %377 = vmatprep.subr.bf16.mxu0 %v714_v13  ;;  %418 = vmatprep.subr.bf16.mxu1 %v716_v14  ;;  %v460_v35 = vunpack.c.l.s4 %v880_v34  ;;  %s633_s23 = sshll.u32 %s918_s13, 6  ;;  %s174_s28 = scalar_lea.vmem [#allocation7], %s594_s20  ;;  %vm484_vm0 = vcmp.lt.s32.totalorder %v462_v36, 512 }
  0x63   : > { %s502_s3 = sshll.u32 %s174_s28, 4  ;;  %s1084_s14 = scalar_lea.hbm %s1130_s2, %s633_s23  ;;  %s1086_s3 = int_to_ptr.vmem [resolvable:$true] %s502_s3 }
  0x64   : > { %v461_v37 = vunpack.c.0.s8 %v460_v35  ;;  %s488_s16 = scalar_lea.sflag [#allocation4], %s1037_s7  ;;  %s802_s27 = scalar_lea.vmem %s1086_s3, 64 }
  0x65   : > { %378 = vmatpush1.bf16.msra.mxu0 %v718_v15  ;;  %419 = vmatpush1.bf16.msra.mxu1 %v719_v16  ;;  %p803_p9 = scmp.ne.s32.totalorder %s1086_s3, %s802_s27  ;;  %p1149_p10 = scmp.ne.s32.totalorder %s1138_s21, 0 }
  0x66   : > { %379 = vmatprep.subr.bf16.mxu0 %v720_v17  ;;  %420 = vmatprep.subr.bf16.mxu1 %v722_v18  ;;  %v464_v41 = vsub.s32 %v461_v37, %v463_v38  ;;  %s881_s13 = smov [#allocation7]  }
  0x67   : > { %p804_p2 = pnand %p803_p9, %p1149_p10  ;;  %s806_s17 = sshll.u32 %s881_s13, 4  ;;  %s807_s17 = int_to_ptr.vmem [resolvable:$false] %s806_s17 }
  0x68   : > { %s808_s19 = scalar_lea.vmem %s807_s17, 128  ;;  %p809_p5 = scmp.lt.s32.totalorder %s1086_s3, %s807_s17 }
  0x69   : > { %380 = vmatpush1.bf16.msra.mxu0 %v724_v19  ;;  %421 = vmatpush1.bf16.msra.mxu1 %v725_v20  ;;  %p805_p4 = pneg %p804_p2  ;;  %p810_p0 = scmp.lt.s32.totalorder %s808_s19, %s802_s27 }
  0x6a   : > { %381 = vmatprep.subr.bf16.mxu0 %v726_v21  ;;  %422 = vmatprep.subr.bf16.mxu1 %v728_v22 }
  0x6b   : > { %p811_p6 = por %p810_p0, %p809_p5 }
  0x6d   : > { %382 = vmatpush1.bf16.msra.mxu0 %v730_v23  ;;  %423 = vmatpush1.bf16.msra.mxu1 %v731_v24  ;;  %p812_p13 = pnand %p811_p6, %p805_p4 }
  0x6e   : > { %383 = vmatprep.subr.bf16.mxu0 %v732_v25  ;;  %424 = vmatprep.subr.bf16.mxu1 %v734_v26 }
  0x71   : > { %384 = vmatpush1.bf16.msra.mxu0 %v736_v27  ;;  %425 = vmatpush1.bf16.msra.mxu1 %v737_v28 }
  0x72   : > { %385 = vmatprep.subr.bf16.mxu0 %v738_v29  ;;  %426 = vmatprep.subr.bf16.mxu1 %v740_v30 }
  0x75   : > { %386 = vmatpush1.bf16.msra.mxu0 %v742_v31  ;;  %427 = vmatpush1.bf16.msra.mxu1 %v743_v32 }
  0x78   : > { %404 = vmatmul.mubr.bf16.vlgmr.msra.gmra.mrb[0].mxu0 %v178_v33  ;;  %445 = vmatmul.mubr.bf16.vlgmr.msra.gmra.mrb[0].mxu1 %v178_v33 }
 0x14b   : > { %v405_v39 = vpop.f32.mrb[0].mxu0  ;;  %v446_v40 = vpop.f32.mrb[0].mxu1 }
 0x14c   : > { %v407_v42 = vpop.f32.mrb[1].mxu0  ;;  %v448_v43 = vpop.f32.mrb[1].mxu1 }
 0x14d   : > { %v457_v44 = vcombine.low %v405_v39, %v407_v42  ;;  %v458_v45 = vcombine.low %v446_v40, %v448_v43  ;;  %v409_v46 = vpop.f32.mrb[2].mxu0  ;;  %v450_v47 = vpop.f32.mrb[2].mxu1 }
 0x14e   : > { %v410_v48 = vpop.f32.mrb[3].mxu0  ;;  %v451_v49 = vpop.f32.mrb[3].mxu1 }
 0x14f   : > { %v465_v50 = vrot.slane %v457_v44, %v464_v41  ;;  %v472_v51 = vrot.slane %v458_v45, %v464_v41 }
 0x151   : > { %v473_v52 = vcombine.low %v465_v50, %v472_v51 }
 0x153   : > { %v480_v53 = vrot.slane %v473_v52, %v464_v41 }
 0x155   : > { %486 = vst.msk [vmem:[%s174_s28] sm:$0xf] %vm484_vm0, %v480_v53 }
 0x156   : > { %815 = shalt.err (!%p812_p13)
}
 0x157   : > { %s816_s24 = scalar_lea.hbm %s1084_s14, 64  ;;  %s820_s5 = scalar_lea.hbm %s1130_s2, 128 }
 0x158   : > { %p817_p7 = scmp.ne.s32.totalorder %s1084_s14, %s816_s24  ;;  %p821_p1 = scmp.lt.u32.totalorder %s1084_s14, %s1130_s2 }
 0x159   : > { %p822_p8 = scmp.lt.u32.totalorder %s820_s5, %s816_s24  ;;  %p824_p9 = scmp.lt.u32.totalorder %s816_s24, %s1084_s14 }
 0x15a   : > { %p818_p3 = pnand %p817_p7, %p1149_p10 }
 0x15b   : > { %p823_p11 = por %p822_p8, %p821_p1 }
 0x15c   : > { %p819_p12 = pneg %p818_p3 }
 0x15d   : > { %p825_p2 = por %p824_p9, %p823_p11 }
 0x15f   : > { %p826_p4 = pnand %p825_p2, %p819_p12 }
 0x161   : > { %829 = shalt.err (!%p826_p4)
}
 0x162   : > { %640 = dma.vmem_to_hbm [thread:$0]  (%p1149_p10), %s1086_s3, 64, %s1084_s14, %s488_s16  }
 0x163 PF: > { %s514_s29 = sand.u32 1, %s860_s9   ;;  %p1150_p5 = scmp.ne.s32.totalorder %s1139_s22, 0 }
 0x164   : > { %p1151_p0 = scmp.ge.s32.totalorder %s872_s12, 2  ;;  %s515_s8 = scalar_lea.sflag [#allocation4], %s514_s29 }
 0x166   : > { %p651_p6 = pnand %p1151_p0, %p1150_p5 }
 0x168   : > { %855 = dma.done.wait (!%p651_p6), %s515_s8, 64  }
 0x169   : > { %857 = vsyncadd (!%p651_p6), %s515_s8, 4294967232  ;;  %p16_p13 = scmp.ge.s32.totalorder %s922_s15, 4   ;;  %s1152_s9 = smov %s864_s10 }
 0x16a   : > { %s1153_s10 = smov %s868_s11  ;;  %s1154_s11 = smov %s934_s18 }
 0x16b   : > { %s1155_s12 = smov %s922_s15  ;;  %18 = sbr.rel (!%p16_p13) target bundleno = 6 (0x6), region = 78 }
 0x172   :  { %520 = vsyncpa [#allocation3], 1 }
 0x173   :  { %522 = vsyncpa [#allocation3 + $0x1], 1 }
 0x174   :  { %523 = vsyncpa [#allocation6], 1 }
 0x175   :  { %525 = vsyncpa [#allocation6 + $0x1], 1 }
 0x176   :  { %526 = vsyncpa [#allocation4], 1 }
 0x177   :  { %528 = vsyncpa [#allocation4 + $0x1], 1 }

</bundles_post_ra>
